<compile_context>
chip_gen: v6e
topology: v6e:2x2x1
jax: 0.10.0
libtpu: 0.0.40
codegen_flags: <defaults>
</compile_context>

<pallas_src>
import math

import jax
import jax.numpy as jnp
from jax.experimental import pallas as pl
from jax.experimental.pallas import tpu as pltpu


def _round_up(x, m):
    return ((x + m - 1) // m) * m


# ---------------------------------------------------------------------------
# Fast path: whole (padded) weight panel resident in VMEM, 1-D grid over batch.
# ---------------------------------------------------------------------------
def _linear_resident_kernel(x_ref, w_ref, b_ref, o_ref):
    # x_ref: (tm, K) compute dtype   (streamed per grid step)
    # w_ref: (K, N)  compute dtype   (resident: constant index_map -> fetched once)
    # b_ref: (1, N)  f32             (resident)
    # o_ref: (tm, N) f32
    acc = jnp.dot(x_ref[...], w_ref[...], preferred_element_type=jnp.float32)
    o_ref[...] = (acc + b_ref[...]).astype(o_ref.dtype)


# ---------------------------------------------------------------------------
# General path: (M, N, K) grid; bias init at k==0, accumulate directly into the
# resident f32 output block (no extra scratch).
# ---------------------------------------------------------------------------
def _linear_tiled_kernel(x_ref, w_ref, b_ref, o_ref):
    k = pl.program_id(2)

    @pl.when(k == 0)
    def _():
        o_ref[...] = jnp.broadcast_to(b_ref[...], o_ref.shape).astype(o_ref.dtype)

    # Canonical [tm,tk] x [tk,tn] -> MXU, f32 accumulation into resident o_ref.
    o_ref[...] += jnp.dot(x_ref[...], w_ref[...],
                          preferred_element_type=jnp.float32)


def multiclass_logistic_regression(x, weight, bias, *,
                                   compute_dtype=jnp.bfloat16,
                                   tm_max=512, tn_max=512, tk_max=2048):
    """Forward pass of nn.Linear(in_features, num_classes).

    x:      [batch, in_features]       float32
    weight: [num_classes, in_features] float32 (PyTorch layout)
    bias:   [num_classes]              float32
    returns [batch, num_classes]       float32
    """
    batch, in_features = x.shape
    num_classes = weight.shape[0]
    out_dtype = jnp.float32

    itemsize = jnp.dtype(compute_dtype).itemsize
    m_align = 16 if itemsize == 2 else 8   # bf16 packs 2 rows / sublane

    # MXU fast path operands; weight pre-transposed once to canonical [K, N].
    x_c = x.astype(compute_dtype)
    w_t = weight.T.astype(compute_dtype)               # [in_features, num_classes]
    b_2 = bias.reshape(1, num_classes).astype(jnp.float32)

    n_pad = _round_up(num_classes, 128)                # lane-dense output stores
    k_pad = _round_up(in_features, 128)

    # M tile: sublane-aligned; give v7x's 2nd TensorCore >=2 parallel blocks once
    # the batch is big enough to be worth splitting.
    tm = min(tm_max, _round_up(batch, m_align))
    if batch >= 128 and _round_up(batch, tm) // tm < 2:
        tm = _round_up((batch + 1) // 2, m_align)
    m_pad = _round_up(batch, tm)

    flops = 2 * batch * in_features * num_classes

    # ---- resident-weight fast path (typical logistic-regression regime) ------
    fast_bytes = (k_pad * n_pad * itemsize             # resident weight panel
                  + 2 * tm * k_pad * itemsize          # double-buffered x tile
                  + 2 * tm * n_pad * 4                 # double-buffered out tile
                  + n_pad * 4)                         # bias
    use_fast_path = fast_bytes <= (24 << 20)

    if use_fast_path:
        x_p = jnp.pad(x_c, ((0, m_pad - batch), (0, k_pad - in_features)))
        w_p = jnp.pad(w_t, ((0, k_pad - in_features), (0, n_pad - num_classes)))
        b_p = jnp.pad(b_2, ((0, 0), (0, n_pad - num_classes)))

        bytes_accessed = (x_p.size * itemsize + w_p.size * itemsize
                          + b_p.size * 4 + m_pad * n_pad * 4)

        out = pl.pallas_call(
            _linear_resident_kernel,
            out_shape=jax.ShapeDtypeStruct((m_pad, n_pad), out_dtype),
            grid_spec=pltpu.PrefetchScalarGridSpec(
                num_scalar_prefetch=0,
                grid=(m_pad // tm,),
                in_specs=[
                    pl.BlockSpec((tm, k_pad), lambda i: (i, 0)),      # x: streamed
                    pl.BlockSpec((k_pad, n_pad), lambda i: (0, 0)),   # W^T: resident
                    pl.BlockSpec((1, n_pad), lambda i: (0, 0)),       # bias: resident
                ],
                out_specs=pl.BlockSpec((tm, n_pad), lambda i: (i, 0)),
            ),
            compiler_params=pltpu.CompilerParams(
                dimension_semantics=("parallel",),
                vmem_limit_bytes=int(min(48 << 20, max(32 << 20, 2 * fast_bytes))),
            ),
            cost_estimate=pl.CostEstimate(
                flops=flops, transcendentals=0, bytes_accessed=int(bytes_accessed)),
        )(x_p, w_p, b_p)
    else:
        # ---------------------- general (M, N, K) tiled path ------------------
        tn = min(_round_up(tn_max, 128), n_pad)
        tk = min(_round_up(tk_max, 128), k_pad)
        n_pad = _round_up(n_pad, tn)
        k_pad = _round_up(k_pad, tk)

        x_p = jnp.pad(x_c, ((0, m_pad - batch), (0, k_pad - in_features)))
        w_p = jnp.pad(w_t, ((0, k_pad - in_features), (0, n_pad - num_classes)))
        b_p = jnp.pad(b_2, ((0, 0), (0, n_pad - num_classes)))

        grid = (m_pad // tm, n_pad // tn, k_pad // tk)

        tiled_bytes = (2 * (tm * tk + tk * tn) * itemsize   # double-buffered inputs
                       + 2 * tm * tn * 4                    # resident/double out
                       + tn * 4)                            # bias
        bytes_accessed = (x_p.size * itemsize * grid[1]      # x re-read per N block
                          + w_p.size * itemsize * grid[0]    # W re-read per M block
                          + b_p.size * 4 * grid[0]
                          + m_pad * n_pad * 4)

        out = pl.pallas_call(
            _linear_tiled_kernel,
            out_shape=jax.ShapeDtypeStruct((m_pad, n_pad), out_dtype),
            grid_spec=pltpu.PrefetchScalarGridSpec(
                num_scalar_prefetch=0,
                grid=grid,
                in_specs=[
                    pl.BlockSpec((tm, tk), lambda i, j, k: (i, k)),   # x tile
                    pl.BlockSpec((tk, tn), lambda i, j, k: (k, j)),   # W^T tile [K,N]
                    pl.BlockSpec((1, tn), lambda i, j, k: (0, j)),    # bias tile
                ],
                out_specs=pl.BlockSpec((tm, tn), lambda i, j, k: (i, j)),
            ),
            compiler_params=pltpu.CompilerParams(
                dimension_semantics=("parallel", "parallel", "arbitrary"),
                vmem_limit_bytes=int(min(48 << 20, max(32 << 20, 2 * tiled_bytes))),
            ),
            cost_estimate=pl.CostEstimate(
                flops=flops, transcendentals=0, bytes_accessed=int(bytes_accessed)),
        )(x_p, w_p, b_p)

    # Slice back to the logical (unpadded) result.
    if (m_pad, n_pad) != (batch, num_classes):
        out = out[:batch, :num_classes]
    return out.astype(x.dtype)


if __name__ == "__main__":
    # Small shapes consistent with the module: in_features=32, num_classes=16, batch=8.
    batch, in_features, num_classes = 8, 32, 16

    key = jax.random.PRNGKey(0)
    k_x, k_w, k_b = jax.random.split(key, 3)

    # Deterministic init mirroring nn.Linear's default uniform(-1/sqrt(fan_in), ...).
    bound = 1.0 / math.sqrt(in_features)
    weight = jax.random.uniform(
        k_w, (num_classes, in_features), jnp.float32, minval=-bound, maxval=bound)
    bias = jax.random.uniform(
        k_b, (num_classes,), jnp.float32, minval=-bound, maxval=bound)
    x = jax.random.normal(k_x, (batch, in_features), jnp.float32)

    # Plain-JAX reference (PyTorch semantics: x @ W.T + b).
    y_ref = x @ weight.T + bias

    # Default bf16-MXU path (f32 accumulation) -> loose tolerance vs f32 reference.
    y = jax.block_until_ready(multiclass_logistic_regression(x, weight, bias))
    assert y.shape == (batch, num_classes)
    assert jnp.allclose(y, y_ref, atol=3e-2, rtol=3e-2), "bf16 path mismatch"

    # Exact-parity f32 path.
    y32 = jax.block_until_ready(
        multiclass_logistic_regression(x, weight, bias, compute_dtype=jnp.float32))
    assert jnp.allclose(y32, y_ref, atol=1e-5, rtol=1e-5), "f32 path mismatch"

    print("KERNEL_OK")
</pallas_src>

<mosaic_0001>
module attributes {stable_mosaic.version = 11 : i64} {
  func.func @_linear_resident_kernel(%arg0: i32, %arg1: memref<16x128xbf16, #tpu.memory_space<vmem>>, %arg2: memref<128x128xbf16, #tpu.memory_space<vmem>>, %arg3: memref<1x128xf32, #tpu.memory_space<vmem>>, %arg4: memref<16x128xf32, #tpu.memory_space<vmem>>) attributes {dimension_semantics = [#tpu.dimension_semantics<parallel>], iteration_bounds = array<i64: 1>, scalar_prefetch = 0 : i64, scratch_operands = 0 : i64, tpu.core_type = #tpu.core_type<tc>, window_params = [{transform_indices = @transform_0, window_bounds = array<i64: 16, 128>}, {pipeline_mode = #tpu.pipeline_mode<synchronous>, transform_indices = @transform_1, window_bounds = array<i64: 128, 128>}, {pipeline_mode = #tpu.pipeline_mode<synchronous>, transform_indices = @transform_2, window_bounds = array<i64: 1, 128>}, {transform_indices = @transform_3, window_bounds = array<i64: 16, 128>}]} {
    %c0 = arith.constant 0 : index
    %c0_0 = arith.constant 0 : index
    %0 = vector.load %arg1[%c0, %c0_0] : memref<16x128xbf16, #tpu.memory_space<vmem>>, vector<16x128xbf16>
    %c0_1 = arith.constant 0 : index
    %c0_2 = arith.constant 0 : index
    %1 = vector.load %arg2[%c0_1, %c0_2] : memref<128x128xbf16, #tpu.memory_space<vmem>>, vector<128x128xbf16>
    %cst = arith.constant dense<0.000000e+00> : vector<16x128xf32>
    %2 = tpu.matmul %0, %1, %cst {dimension_numbers = #tpu.dot_dimension_numbers<[1], [0], [0], [1], [0, 0, 1, 1], [], []>} : vector<16x128xbf16>, vector<128x128xbf16>, vector<16x128xf32> -> vector<16x128xf32>
    %c0_3 = arith.constant 0 : index
    %c0_4 = arith.constant 0 : index
    %3 = vector.load %arg3[%c0_3, %c0_4] : memref<1x128xf32, #tpu.memory_space<vmem>>, vector<1x128xf32>
    %4 = vector.broadcast %3 : vector<1x128xf32> to vector<16x128xf32>
    %5 = arith.addf %2, %4 : vector<16x128xf32>
    %c0_5 = arith.constant 0 : index
    %c0_6 = arith.constant 0 : index
    %6 = vector.load %arg4[%c0_5, %c0_6] : memref<16x128xf32, #tpu.memory_space<vmem>>, vector<16x128xf32>
    tpu.vector_store %arg4[%c0_5, %c0_6], %5 {strides = array<i32>} : memref<16x128xf32, #tpu.memory_space<vmem>>, vector<16x128xf32>,
    return
  }
  func.func @transform_0(%arg0: i32) -> (i32, i32) {
    %c0_i32 = arith.constant 0 : i32
    %c0_i32_0 = arith.constant 0 : i32
    return %arg0, %c0_i32 : i32, i32
  }
  func.func @transform_1(%arg0: i32) -> (i32, i32) {
    %c0_i32 = arith.constant 0 : i32
    %c0_i32_0 = arith.constant 0 : i32
    %c0_i32_1 = arith.constant 0 : i32
    return %c0_i32, %c0_i32_0 : i32, i32
  }
  func.func @transform_2(%arg0: i32) -> (i32, i32) {
    %c0_i32 = arith.constant 0 : i32
    %c0_i32_0 = arith.constant 0 : i32
    %c0_i32_1 = arith.constant 0 : i32
    return %c0_i32, %c0_i32_0 : i32, i32
  }
  func.func @transform_3(%arg0: i32) -> (i32, i32) {
    %c0_i32 = arith.constant 0 : i32
    %c0_i32_0 = arith.constant 0 : i32
    return %arg0, %c0_i32 : i32, i32
  }
}

</mosaic_0001>

<bundles_post_ra>
// kernel: tpu_custom_call.1
= control target key start
LH: loop header
LB: loop body
LE: loop exit
PB: predicated region body
PF: predicated region fallthrough
CT: control target
= control target key end

     0   :  { %8 = vsyncpa [#allocation3], 0  ;;  %s348_s0 = inlined_call_operand.hbm [shape: bf16[16,128], index: 0, kind: input, shape index: {}]   ;;  %s349_s1 = inlined_call_operand.hbm [shape: bf16[128,128], index: 1, kind: input, shape index: {}]   ;;  %s350_s2 = inlined_call_operand.vmem [shape: f32[1,128], index: 2, kind: input, shape index: {}]   ;;  %s351_s3 = inlined_call_operand.hbm [shape: f32[16,128], index: 3, kind: output, shape index: {}]  }
   0x1   :  { %9 = vsyncpa [#allocation6], 0 }
   0x2   :  { %10 = vsyncpa [#allocation4], 0  ;;  %s307_s12 = smov [#allocation2]  }
   0x3   :  { %s16_s13 = sshll.u32 %s307_s12, 4  ;;  %s17_s13 = int_to_ptr.vmem [resolvable:$true] %s16_s13 }
   0x4   :  { %s249_s14 = scalar_lea.vmem %s17_s13, 128  ;;  %p254_p1 = scmp.lt.s32.totalorder %s17_s13, %s17_s13 }
   0x5   :  { %p250_p0 = scmp.ne.s32.totalorder %s17_s13, %s249_s14  ;;  %p255_p2 = scmp.lt.s32.totalorder %s249_s14, %s249_s14 }
   0x7   :  { %p256_p3 = por %p255_p2, %p254_p1 }
   0x9   :  { %p257_p4 = pnand %p256_p3, %p250_p0 }
   0xb   :  { %260 = shalt.err (!%p257_p4)
}
   0xc   :  { %s308_s15 = smov 64   ;;  %s309_s16 = smov 4  }
   0xd   :  { %22 = dma.hbm_to_vmem [thread:$0]  %s348_s0, 128, %s17_s13, [#allocation3], %s308_s15, %s308_s15, %s309_s16  }
   0xe   :  { %s310_s19 = smov [#allocation5]  }
   0xf   :  { %s28_s20 = sshll.u32 %s310_s19, 4  ;;  %s29_s20 = int_to_ptr.vmem [resolvable:$true] %s28_s20 }
  0x10   :  { %s269_s21 = scalar_lea.vmem %s29_s20, 1024  ;;  %p274_p6 = scmp.lt.s32.totalorder %s29_s20, %s29_s20 }
  0x11   :  { %p270_p5 = scmp.ne.s32.totalorder %s29_s20, %s269_s21  ;;  %p275_p7 = scmp.lt.s32.totalorder %s269_s21, %s269_s21 }
  0x13   :  { %p276_p8 = por %p275_p7, %p274_p6 }
  0x15   :  { %p277_p9 = pnand %p276_p8, %p270_p5 }
  0x17   :  { %280 = shalt.err (!%p277_p9)
}
  0x18   :  { %34 = dma.hbm_to_vmem [thread:$0]  %s349_s1, 1024, %s29_s20, [#allocation6], %s308_s15, %s308_s15, %s309_s16  }
  0x19   :  { %301 = dma.done.wait [#allocation3], 128  }
  0x1a   :  { %302 = vsyncadd [#allocation3], 4294967168 }
  0x1b   :  { %303 = dma.done.wait [#allocation6], 1024  }
  0x1c   :  { %304 = vsyncadd [#allocation6], 4294966272  ;;  %v311_v0 = vmov 0.0   ;;  %vm312_vm0 = vmmov 0   ;;  %v232_v1 = vld [vmem:[#allocation5 + $0x38] sm:$0xff]   ;;  %v233_v2 = vld [vmem:[#allocation5 + $0x30] sm:$0xff]  }
  0x1d   :  { %203 = vmatprep.subr.bf16.mxu0 %v311_v0  ;;  %219 = vmatprep.mubr.msk.bf16.mxu0 %vm312_vm0, %v311_v0  ;;  %v234_v3 = vld [vmem:[#allocation5 + $0x28] sm:$0xff]   ;;  %v235_v4 = vld [vmem:[#allocation5 + $0x20] sm:$0xff]   ;;  %v236_v5 = vld [vmem:[#allocation5 + $0x18] sm:$0xff]   ;;  %s313_s24 = smov [#allocation7]  }
  0x1e   :  { %204 = vmatpush3.bf16.msra.mxu0 %v232_v1  ;;  %v237_v6 = vld [vmem:[#allocation5 + $0x10] sm:$0xff]   ;;  %v238_v7 = vld [vmem:[#allocation5 + $0x8] sm:$0xff]   ;;  %v239_v8 = vld [vmem:[#allocation5] sm:$0xff]   ;;  %s171_s25 = sshll.u32 %s313_s24, 4  ;;  %s172_s25 = int_to_ptr.vmem [resolvable:$true] %s171_s25 }
  0x1f   :  { %205 = vmatprep.subr.bf16.mxu0 %v311_v0  ;;  %v240_v9 = vld [vmem:[#allocation2] sm:$0xff]   ;;  %s281_s26 = scalar_lea.vmem %s172_s25, 256  ;;  %p286_p11 = scmp.lt.s32.totalorder %s172_s25, %s172_s25 }
  0x20   :  { %v184_v10 = vld [vmem:[%s350_s2] ss:$0 sm:$0xff]  ;;  %p282_p10 = scmp.ne.s32.totalorder %s172_s25, %s281_s26  ;;  %p287_p12 = scmp.lt.s32.totalorder %s281_s26, %s281_s26 }
  0x22   :  { %206 = vmatpush3.bf16.msra.mxu0 %v233_v2  ;;  %p288_p13 = por %p287_p12, %p286_p11 }
  0x23   :  { %207 = vmatprep.subr.bf16.mxu0 %v311_v0 }
  0x24   :  { %p289_p0 = pnand %p288_p13, %p282_p10 }
  0x26   :  { %208 = vmatpush3.bf16.msra.mxu0 %v234_v3 }
  0x27   :  { %209 = vmatprep.subr.bf16.mxu0 %v311_v0 }
  0x2a   :  { %210 = vmatpush3.bf16.msra.mxu0 %v235_v4 }
  0x2b   :  { %211 = vmatprep.subr.bf16.mxu0 %v311_v0 }
  0x2e   :  { %212 = vmatpush3.bf16.msra.mxu0 %v236_v5 }
  0x2f   :  { %213 = vmatprep.subr.bf16.mxu0 %v311_v0 }
  0x32   :  { %214 = vmatpush3.bf16.msra.mxu0 %v237_v6 }
  0x33   :  { %215 = vmatprep.subr.bf16.mxu0 %v311_v0 }
  0x36   :  { %216 = vmatpush3.bf16.msra.mxu0 %v238_v7 }
  0x37   :  { %217 = vmatprep.subr.bf16.mxu0 %v311_v0 }
  0x3a   :  { %218 = vmatpush3.bf16.msra.mxu0 %v239_v8 }
  0x3d   :  { %220 = vmatmul.mubr.bf16.vlgmr.msra.gmra.mxu0 %v240_v9 }
  0xfd   :  { %v157_v11 = vpop.f32.mrf.mxu0 }
  0xfe   :  { %v158_v12 = vadd.f32 %v184_v10, %v157_v11 }
  0xff   :  { %v221_v13 = vpop.f32.mrf.mxu0 }
 0x100   :  { %164 = vst [vmem:[#allocation7] sm:$0xff] %v158_v12 }
 0x101   :  { %v160_v14 = vpop.f32.mrf.mxu0 }
 0x102   :  { %v161_v15 = vadd.f32 %v184_v10, %v160_v14 }
 0x103   :  { %v222_v16 = vpop.f32.mrf.mxu0 }
 0x104   :  { %165 = vst [vmem:[#allocation7 + $0x8] sm:$0xff] %v161_v15 }
 0x105   :  { %292 = shalt.err (!%p289_p0)
}
 0x106   :  { %s314_s27 = smov 128   ;;  %s315_s2 = smov 8  }
 0x107   :  { %177 = dma.vmem_to_hbm [thread:$0]  %s172_s25, 256, %s351_s3, [#allocation4], %s314_s27, %s314_s27, %s315_s2  }
 0x108   :  { %305 = dma.done.wait [#allocation4], 256  }
 0x109   :  { %306 = vsyncadd [#allocation4], 4294967040 }
 0x10a   :  { %181 = vsyncpa [#allocation3], 1 }
 0x10b   :  { %182 = vsyncpa [#allocation6], 1 }
 0x10c   :  { %183 = vsyncpa [#allocation4], 1 }

</bundles_post_ra>
